<compile_context>
chip_gen: v7x
topology: tpu7x:2x2x1
jax: 0.10.0
libtpu: 0.0.40
codegen_flags: <defaults>
</compile_context>

<pallas_src>
import functools

import jax
import jax.numpy as jnp
from jax import lax
from jax.experimental import pallas as pl
from jax.experimental.pallas import tpu as pltpu

_VMEM_LIMIT = 32 * 1024 * 1024  # explicit scoped-VMEM budget (safe on v5e/v6e/v7x)


def _pick_tile(n, candidates):
    """Largest candidate tile that divides n (fallback: whole dim)."""
    for c in candidates:
        if n % c == 0:
            return c
    return n


# --------------------------------------------------------------------------
# FC head kernel:  (M, K) f32 @ (K, N) bf16 + (1, N) f32  ->  (M, N) f32
# 2-D ('parallel', 'parallel') grid over (row tiles, vocab tiles).
# --------------------------------------------------------------------------
def _proj_kernel(x_ref, w_ref, b_ref, o_ref):
    o_ref[...] = (
        jnp.dot(x_ref[...].astype(w_ref.dtype), w_ref[...],
                preferred_element_type=jnp.float32)
        + b_ref[...]
    ).astype(o_ref.dtype)


def _projection(x, w, b):
    """x @ w + b, tiled over rows and output columns (both 'parallel')."""
    M, K = x.shape
    N = w.shape[1]
    tn = _pick_tile(N, (512, 256, 128))
    tm = _pick_tile(M, (512, 256, 128, 64, 32, 16, 8))
    return pl.pallas_call(
        _proj_kernel,
        out_shape=jax.ShapeDtypeStruct((M, N), jnp.float32),
        grid_spec=pltpu.PrefetchScalarGridSpec(
            num_scalar_prefetch=0,
            grid=(M // tm, N // tn),
            in_specs=[
                pl.BlockSpec((tm, K), lambda m, n: (m, 0)),    # activations
                pl.BlockSpec((K, tn), lambda m, n: (0, n)),    # bf16 weight tile
                pl.BlockSpec((1, tn), lambda m, n: (0, n)),    # bias tile
            ],
            out_specs=pl.BlockSpec((tm, tn), lambda m, n: (m, n)),
        ),
        compiler_params=pltpu.CompilerParams(
            dimension_semantics=("parallel", "parallel"),
            vmem_limit_bytes=_VMEM_LIMIT,
        ),
    )(x, w, b)


# --------------------------------------------------------------------------
# LSTM recurrence kernel, streamed over time chunks with fused input proj.
#   grid = (batch_tiles 'parallel', time_chunks 'arbitrary')
#   per grid step: x chunk (Tc, tb, E)  ->  hs chunk (Tc, tb, H)
#   (h, c) carried across time chunks in VMEM scratch.
# --------------------------------------------------------------------------
def _lstm_chunk_kernel(x_ref, wih_ref, whh_ref, b_ref, hs_ref,
                       xg_sc, h_sc, c_sc, *, hidden_size, chunk):
    H = hidden_size
    Tc, tb, E = x_ref.shape

    # New batch tile starts at time-chunk 0: torch hidden = (zeros, zeros).
    @pl.when(pl.program_id(1) == 0)
    def _():
        h_sc[...] = jnp.zeros_like(h_sc)
        c_sc[...] = jnp.zeros_like(c_sc)

    # Hoisted, batched input projection for the whole chunk (off the serial
    # h-dependency path): one (Tc*tb, E) @ (E, 4H) matmul, f32 accumulation.
    x_flat = x_ref[...].reshape(Tc * tb, E).astype(jnp.bfloat16)
    xg_sc[...] = (
        jnp.dot(x_flat, wih_ref[...], preferred_element_type=jnp.float32)
        + b_ref[...]
    ).reshape(Tc, tb, 4 * H)

    # Recurrence: only h @ W_hh + gate math on the critical path.
    # Static Python loop over the small chunk == full unroll, bounded by Tc.
    h = h_sc[...]
    c = c_sc[...]
    for t in range(chunk):
        gates = xg_sc[t] + jnp.dot(
            h.astype(jnp.bfloat16), whh_ref[...],
            preferred_element_type=jnp.float32)                 # (tb, 4H) f32
        i_g = jax.nn.sigmoid(gates[:, 0 * H:1 * H])
        f_g = jax.nn.sigmoid(gates[:, 1 * H:2 * H])
        g_g = jnp.tanh(gates[:, 2 * H:3 * H])
        o_g = jax.nn.sigmoid(gates[:, 3 * H:4 * H])
        c = f_g * c + i_g * g_g
        h = o_g * jnp.tanh(c)
        hs_ref[t] = h.astype(hs_ref.dtype)
    h_sc[...] = h
    c_sc[...] = c


def _lstm_recurrence(x_tm, w_ih, w_hh, b_lstm, *, hidden_size, chunk, batch_tile):
    Tp, Bp, E = x_tm.shape
    H = hidden_size
    G = 4 * H
    nb = Bp // batch_tile
    nt = Tp // chunk
    kernel = functools.partial(_lstm_chunk_kernel, hidden_size=H, chunk=chunk)
    return pl.pallas_call(
        kernel,
        out_shape=jax.ShapeDtypeStruct((Tp, Bp, H), jnp.float32),
        grid_spec=pltpu.PrefetchScalarGridSpec(
            num_scalar_prefetch=0,
            grid=(nb, nt),
            in_specs=[
                pl.BlockSpec((chunk, batch_tile, E), lambda b, t: (t, b, 0)),
                pl.BlockSpec((E, G), lambda b, t: (0, 0)),      # W_ih (bf16)
                pl.BlockSpec((H, G), lambda b, t: (0, 0)),      # W_hh (bf16)
                pl.BlockSpec((1, G), lambda b, t: (0, 0)),      # b_ih + b_hh
            ],
            out_specs=pl.BlockSpec((chunk, batch_tile, H), lambda b, t: (t, b, 0)),
            scratch_shapes=[
                pltpu.VMEM((chunk, batch_tile, G), jnp.float32),  # chunk gates
                pltpu.VMEM((batch_tile, H), jnp.float32),         # h carry
                pltpu.VMEM((batch_tile, H), jnp.float32),         # c carry
            ],
        ),
        compiler_params=pltpu.CompilerParams(
            dimension_semantics=("parallel", "arbitrary"),
            vmem_limit_bytes=_VMEM_LIMIT,
        ),
    )(x_tm, w_ih, w_hh, b_lstm)


# --------------------------------------------------------------------------
# Full forward pass.
# --------------------------------------------------------------------------
def decoder_rnn_forward(features, captions, params):
    """features: (B, E) f32, captions: (B, T) i32  ->  (B, T, V) f32."""
    embed_tbl = params["embed"]                   # (V, E) f32
    w_ih = params["w_ih"].astype(jnp.bfloat16)    # (E, 4H) -> bf16 for MXU
    w_hh = params["w_hh"].astype(jnp.bfloat16)    # (H, 4H)
    b_lstm = params["b_lstm"]                     # (1, 4H) f32 = b_ih + b_hh
    w_fc = params["w_fc"].astype(jnp.bfloat16)    # (H, V)
    b_fc = params["b_fc"]                         # (1, V) f32

    B, E = features.shape
    H = params["w_hh"].shape[0]
    V = params["w_fc"].shape[1]

    # Glue in plain JAX: embedding gather + concat (no clean static BlockSpec).
    embedded = jnp.take(embed_tbl, captions[:, :-1], axis=0)       # (B, T-1, E)
    x = jnp.concatenate([features[:, None, :], embedded], axis=1)  # (B, T, E)
    T = x.shape[1]

    # Pad batch to the f32 sublane count (8) and time to a multiple of the
    # chunk (padded timesteps are causally harmless, sliced off below).
    TC = 4                                         # time steps per chunk (4-8)
    Bp = ((B + 7) // 8) * 8
    Tp = ((T + TC - 1) // TC) * TC
    if (Bp, Tp) != (B, T):
        x = jnp.pad(x, ((0, Bp - B), (0, Tp - T), (0, 0)))

    # Batch tile: split across the two v7x TensorCores when possible.
    if Bp >= 16 and (Bp // 2) % 8 == 0:
        tb = Bp // 2
    else:
        tb = Bp

    # Recurrence (with fused per-chunk input projection), time-major.
    x_tm = jnp.transpose(x, (1, 0, 2))                              # (Tp, Bp, E)
    hs_tm = _lstm_recurrence(x_tm, w_ih, w_hh, b_lstm,
                             hidden_size=H, chunk=TC, batch_tile=tb)  # (Tp,Bp,H)

    # Reorder the SMALL hidden states (not the huge logits) to batch-major so
    # the FC kernel writes logits directly in (B, T, V) layout.
    hs_bm = jnp.transpose(hs_tm[:T], (1, 0, 2)).reshape(Bp * T, H)  # (Bp*T, H)

    # Pad vocab to a lane-dense, tileable multiple of 256; slice off after.
    Vp = ((V + 255) // 256) * 256
    if Vp != V:
        w_fc = jnp.pad(w_fc, ((0, 0), (0, Vp - V)))
        b_fc = jnp.pad(b_fc, ((0, 0), (0, Vp - V)))

    logits = _projection(hs_bm, w_fc, b_fc)                         # (Bp*T, Vp)
    logits = logits.reshape(Bp, T, Vp)
    return logits[:B, :, :V]                       # drop batch / vocab padding

# TODO(synk): DecoderRNN.sample() (greedy, data-dependent-length decode loop) is
# not implemented; only the training-time forward() is kernelized.


# --------------------------------------------------------------------------
# Pure-JAX f32 reference (lax.scan LSTM) for correctness checking.
# --------------------------------------------------------------------------
def _reference_forward(features, captions, params):
    embed_tbl = params["embed"]
    w_ih, w_hh, b = params["w_ih"], params["w_hh"], params["b_lstm"]
    w_fc, b_fc = params["w_fc"], params["b_fc"]
    H = w_hh.shape[0]

    embedded = jnp.take(embed_tbl, captions[:, :-1], axis=0)
    x = jnp.concatenate([features[:, None, :], embedded], axis=1)
    x_tm = jnp.transpose(x, (1, 0, 2))

    B = features.shape[0]
    h0 = jnp.zeros((B, H), jnp.float32)
    c0 = jnp.zeros((B, H), jnp.float32)

    def step(carry, x_t):
        h, c = carry
        gates = x_t @ w_ih + h @ w_hh + b
        i = jax.nn.sigmoid(gates[:, 0 * H:1 * H])
        f = jax.nn.sigmoid(gates[:, 1 * H:2 * H])
        g = jnp.tanh(gates[:, 2 * H:3 * H])
        o = jax.nn.sigmoid(gates[:, 3 * H:4 * H])
        c = f * c + i * g
        h = o * jnp.tanh(c)
        return (h, c), h

    (_, _), hs = lax.scan(step, (h0, c0), x_tm)           # (T, B, H)
    logits = hs @ w_fc + b_fc                             # (T, B, V)
    return jnp.transpose(logits, (1, 0, 2))


def init_params(key, embed_size, hidden_size, vocab_size):
    """Deterministic synthetic parameters (shapes match the torch module)."""
    ks = jax.random.split(key, 7)
    s = 0.05
    return {
        "embed": jax.random.normal(ks[0], (vocab_size, embed_size), jnp.float32) * s,
        # stored transposed: (in, 4H) so kernels compute x @ W
        "w_ih": jax.random.normal(ks[1], (embed_size, 4 * hidden_size), jnp.float32) * s,
        "w_hh": jax.random.normal(ks[2], (hidden_size, 4 * hidden_size), jnp.float32) * s,
        "b_lstm": (jax.random.normal(ks[3], (1, 4 * hidden_size), jnp.float32) * s
                   + jax.random.normal(ks[4], (1, 4 * hidden_size), jnp.float32) * s),
        "w_fc": jax.random.normal(ks[5], (hidden_size, vocab_size), jnp.float32) * s,
        "b_fc": jax.random.normal(ks[6], (1, vocab_size), jnp.float32) * s,
    }


if __name__ == "__main__":
    # Small shapes consistent with the module's forward().
    # H = E = 128 so LSTM gate slices land on lane boundaries; vocab=200
    # exercises the pad-to-256 FC path; cap_len=10 exercises time-chunk
    # padding and the scratch-carried (h, c) across chunks.
    batch = 4            # wrapper pads batch to 8 (sublanes) internally
    embed_size = 128
    hidden_size = 128
    vocab_size = 200
    cap_len = 10         # LSTM runs cap_len steps (1 feature + cap_len-1 tokens)

    key = jax.random.PRNGKey(0)
    k_par, k_feat, k_cap = jax.random.split(key, 3)

    params = init_params(k_par, embed_size, hidden_size, vocab_size)
    features = jax.random.normal(k_feat, (batch, embed_size), jnp.float32)
    captions = jax.random.randint(k_cap, (batch, cap_len), 0, vocab_size,
                                  dtype=jnp.int32)

    out = jax.jit(decoder_rnn_forward)(features, captions, params)
    out = jax.block_until_ready(out)

    ref = jax.block_until_ready(_reference_forward(features, captions, params))
    assert out.shape == (batch, cap_len, vocab_size), out.shape
    # Tolerance relaxed vs. the all-f32 version: kernel matmuls use bf16
    # weights/activations with f32 accumulation (gate math / state stay f32).
    assert jnp.allclose(out, ref, atol=3e-2, rtol=3e-2), (
        float(jnp.max(jnp.abs(out - ref))))

    print("KERNEL_OK")
</pallas_src>

<mosaic_0001>
module attributes {stable_mosaic.version = 11 : i64} {
  func.func @_lstm_chunk_kernel(%arg0: i32, %arg1: i32, %arg2: memref<4x8x128xf32, #tpu.memory_space<vmem>>, %arg3: memref<128x512xbf16, #tpu.memory_space<vmem>>, %arg4: memref<128x512xbf16, #tpu.memory_space<vmem>>, %arg5: memref<1x512xf32, #tpu.memory_space<vmem>>, %arg6: memref<4x8x128xf32, #tpu.memory_space<vmem>>, %arg7: memref<4x8x512xf32, #tpu.memory_space<vmem>>, %arg8: memref<8x128xf32, #tpu.memory_space<vmem>>, %arg9: memref<8x128xf32, #tpu.memory_space<vmem>>) attributes {dimension_semantics = [#tpu.dimension_semantics<parallel>, #tpu.dimension_semantics<arbitrary>], iteration_bounds = array<i64: 1, 3>, scalar_prefetch = 0 : i64, scratch_operands = 3 : i64, tpu.core_type = #tpu.core_type<tc>, window_params = [{transform_indices = @transform_0, window_bounds = array<i64: 4, 8, 128>}, {pipeline_mode = #tpu.pipeline_mode<synchronous>, transform_indices = @transform_1, window_bounds = array<i64: 128, 512>}, {pipeline_mode = #tpu.pipeline_mode<synchronous>, transform_indices = @transform_2, window_bounds = array<i64: 128, 512>}, {pipeline_mode = #tpu.pipeline_mode<synchronous>, transform_indices = @transform_3, window_bounds = array<i64: 1, 512>}, {transform_indices = @transform_4, window_bounds = array<i64: 4, 8, 128>}]} {
    %c0_i32 = arith.constant 0 : i32
    %0 = arith.cmpi eq, %arg1, %c0_i32 : i32
    %1 = arith.extui %0 : i1 to i32
    %c0_i32_0 = arith.constant 0 : i32
    %2 = arith.cmpi ne, %1, %c0_i32_0 : i32
    scf.if %2 {
      %cst_63 = arith.constant 0.000000e+00 : f32
      %153 = vector.broadcast %cst_63 : f32 to vector<8x128xf32>
      %c0_64 = arith.constant 0 : index
      %c0_65 = arith.constant 0 : index
      %154 = vector.load %arg8[%c0_64, %c0_65] : memref<8x128xf32, #tpu.memory_space<vmem>>, vector<8x128xf32>
      tpu.vector_store %arg8[%c0_64, %c0_65], %153 {strides = array<i32>} : memref<8x128xf32, #tpu.memory_space<vmem>>, vector<8x128xf32>,
      %cst_66 = arith.constant 0.000000e+00 : f32
      %155 = vector.broadcast %cst_66 : f32 to vector<8x128xf32>
      %c0_67 = arith.constant 0 : index
      %c0_68 = arith.constant 0 : index
      %156 = vector.load %arg9[%c0_67, %c0_68] : memref<8x128xf32, #tpu.memory_space<vmem>>, vector<8x128xf32>
      tpu.vector_store %arg9[%c0_67, %c0_68], %155 {strides = array<i32>} : memref<8x128xf32, #tpu.memory_space<vmem>>, vector<8x128xf32>,
    } else {
    }
    %c0 = arith.constant 0 : index
    %c0_1 = arith.constant 0 : index
    %c0_2 = arith.constant 0 : index
    %3 = vector.load %arg2[%c0, %c0_1, %c0_2] : memref<4x8x128xf32, #tpu.memory_space<vmem>>, vector<4x8x128xf32>
    %4 = vector.shape_cast %3 : vector<4x8x128xf32> to vector<32x128xf32>
    %5 = arith.truncf %4 : vector<32x128xf32> to vector<32x128xbf16>
    %c0_3 = arith.constant 0 : index
    %c0_4 = arith.constant 0 : index
    %6 = vector.load %arg3[%c0_3, %c0_4] : memref<128x512xbf16, #tpu.memory_space<vmem>>, vector<128x512xbf16>
    %cst = arith.constant dense<0.000000e+00> : vector<32x512xf32>
    %7 = tpu.matmul %5, %6, %cst {dimension_numbers = #tpu.dot_dimension_numbers<[1], [0], [0], [1], [0, 0, 1, 1], [], []>} : vector<32x128xbf16>, vector<128x512xbf16>, vector<32x512xf32> -> vector<32x512xf32>
    %c0_5 = arith.constant 0 : index
    %c0_6 = arith.constant 0 : index
    %8 = vector.load %arg5[%c0_5, %c0_6] : memref<1x512xf32, #tpu.memory_space<vmem>>, vector<1x512xf32>
    %9 = vector.broadcast %8 : vector<1x512xf32> to vector<32x512xf32>
    %10 = arith.addf %7, %9 : vector<32x512xf32>
    %11 = vector.shape_cast %10 : vector<32x512xf32> to vector<4x8x512xf32>
    %c0_7 = arith.constant 0 : index
    %c0_8 = arith.constant 0 : index
    %c0_9 = arith.constant 0 : index
    %12 = vector.load %arg7[%c0_7, %c0_8, %c0_9] : memref<4x8x512xf32, #tpu.memory_space<vmem>>, vector<4x8x512xf32>
    tpu.vector_store %arg7[%c0_7, %c0_8, %c0_9], %11 {strides = array<i32>} : memref<4x8x512xf32, #tpu.memory_space<vmem>>, vector<4x8x512xf32>,
    %c0_10 = arith.constant 0 : index
    %c0_11 = arith.constant 0 : index
    %13 = vector.load %arg8[%c0_10, %c0_11] : memref<8x128xf32, #tpu.memory_space<vmem>>, vector<8x128xf32>
    %c0_12 = arith.constant 0 : index
    %c0_13 = arith.constant 0 : index
    %14 = vector.load %arg9[%c0_12, %c0_13] : memref<8x128xf32, #tpu.memory_space<vmem>>, vector<8x128xf32>
    %c0_14 = arith.constant 0 : index
    %c0_15 = arith.constant 0 : index
    %c0_16 = arith.constant 0 : index
    %15 = vector.load %arg7[%c0_14, %c0_15, %c0_16] : memref<4x8x512xf32, #tpu.memory_space<vmem>>, vector<1x8x512xf32>
    %16 = vector.shape_cast %15 : vector<1x8x512xf32> to vector<8x512xf32>
    %17 = arith.truncf %13 : vector<8x128xf32> to vector<8x128xbf16>
    %c0_17 = arith.constant 0 : index
    %c0_18 = arith.constant 0 : index
    %18 = vector.load %arg4[%c0_17, %c0_18] : memref<128x512xbf16, #tpu.memory_space<vmem>>, vector<128x512xbf16>
    %cst_19 = arith.constant dense<0.000000e+00> : vector<8x512xf32>
    %19 = tpu.matmul %17, %18, %cst_19 {dimension_numbers = #tpu.dot_dimension_numbers<[1], [0], [0], [1], [0, 0, 1, 1], [], []>} : vector<8x128xbf16>, vector<128x512xbf16>, vector<8x512xf32> -> vector<8x512xf32>
    %20 = arith.addf %16, %19 : vector<8x512xf32>
    %21 = vector.extract_strided_slice %20 {offsets = [0, 0], sizes = [8, 128], strides = [1, 1]} : vector<8x512xf32> to vector<8x128xf32>
    %22 = arith.negf %21 : vector<8x128xf32>
    %23 = math.exp %22 : vector<8x128xf32>
    %cst_20 = arith.constant 1.000000e+00 : f32
    %24 = vector.broadcast %cst_20 : f32 to vector<8x128xf32>
    %25 = arith.addf %24, %23 : vector<8x128xf32>
    %26 = arith.divf %24, %25 : vector<8x128xf32>
    %27 = vector.extract_strided_slice %20 {offsets = [0, 128], sizes = [8, 128], strides = [1, 1]} : vector<8x512xf32> to vector<8x128xf32>
    %28 = arith.negf %27 : vector<8x128xf32>
    %29 = math.exp %28 : vector<8x128xf32>
    %cst_21 = arith.constant 1.000000e+00 : f32
    %30 = vector.broadcast %cst_21 : f32 to vector<8x128xf32>
    %31 = arith.addf %30, %29 : vector<8x128xf32>
    %32 = arith.divf %30, %31 : vector<8x128xf32>
    %33 = vector.extract_strided_slice %20 {offsets = [0, 256], sizes = [8, 128], strides = [1, 1]} : vector<8x512xf32> to vector<8x128xf32>
    %34 = math.tanh %33 : vector<8x128xf32>
    %35 = vector.extract_strided_slice %20 {offsets = [0, 384], sizes = [8, 128], strides = [1, 1]} : vector<8x512xf32> to vector<8x128xf32>
    %36 = arith.negf %35 : vector<8x128xf32>
    %37 = math.exp %36 : vector<8x128xf32>
    %cst_22 = arith.constant 1.000000e+00 : f32
    %38 = vector.broadcast %cst_22 : f32 to vector<8x128xf32>
    %39 = arith.addf %38, %37 : vector<8x128xf32>
    %40 = arith.divf %38, %39 : vector<8x128xf32>
    %41 = arith.mulf %32, %14 : vector<8x128xf32>
    %42 = arith.mulf %26, %34 : vector<8x128xf32>
    %43 = arith.addf %41, %42 : vector<8x128xf32>
    %44 = math.tanh %43 : vector<8x128xf32>
    %45 = arith.mulf %40, %44 : vector<8x128xf32>
    %c0_23 = arith.constant 0 : index
    %c0_24 = arith.constant 0 : index
    %c0_25 = arith.constant 0 : index
    %46 = vector.load %arg6[%c0_23, %c0_24, %c0_25] : memref<4x8x128xf32, #tpu.memory_space<vmem>>, vector<1x8x128xf32>
    %47 = vector.shape_cast %46 : vector<1x8x128xf32> to vector<8x128xf32>
    %48 = vector.shape_cast %45 : vector<8x128xf32> to vector<1x8x128xf32>
    tpu.vector_store %arg6[%c0_23, %c0_24, %c0_25], %48 {strides = array<i32>} : memref<4x8x128xf32, #tpu.memory_space<vmem>>, vector<1x8x128xf32>,
    %c1 = arith.constant 1 : index
    %c0_26 = arith.constant 0 : index
    %c0_27 = arith.constant 0 : index
    %49 = vector.load %arg7[%c1, %c0_26, %c0_27] : memref<4x8x512xf32, #tpu.memory_space<vmem>>, vector<1x8x512xf32>
    %50 = vector.shape_cast %49 : vector<1x8x512xf32> to vector<8x512xf32>
    %51 = arith.truncf %45 : vector<8x128xf32> to vector<8x128xbf16>
    %c0_28 = arith.constant 0 : index
    %c0_29 = arith.constant 0 : index
    %52 = vector.load %arg4[%c0_28, %c0_29] : memref<128x512xbf16, #tpu.memory_space<vmem>>, vector<128x512xbf16>
    %cst_30 = arith.constant dense<0.000000e+00> : vector<8x512xf32>
    %53 = tpu.matmul %51, %52, %cst_30 {dimension_numbers = #tpu.dot_dimension_numbers<[1], [0], [0], [1], [0, 0, 1, 1], [], []>} : vector<8x128xbf16>, vector<128x512xbf16>, vector<8x512xf32> -> vector<8x512xf32>
    %54 = arith.addf %50, %53 : vector<8x512xf32>
    %55 = vector.extract_strided_slice %54 {offsets = [0, 0], sizes = [8, 128], strides = [1, 1]} : vector<8x512xf32> to vector<8x128xf32>
    %56 = arith.negf %55 : vector<8x128xf32>
    %57 = math.exp %56 : vector<8x128xf32>
    %cst_31 = arith.constant 1.000000e+00 : f32
    %58 = vector.broadcast %cst_31 : f32 to vector<8x128xf32>
    %59 = arith.addf %58, %57 : vector<8x128xf32>
    %60 = arith.divf %58, %59 : vector<8x128xf32>
    %61 = vector.extract_strided_slice %54 {offsets = [0, 128], sizes = [8, 128], strides = [1, 1]} : vector<8x512xf32> to vector<8x128xf32>
    %62 = arith.negf %61 : vector<8x128xf32>
    %63 = math.exp %62 : vector<8x128xf32>
    %cst_32 = arith.constant 1.000000e+00 : f32
    %64 = vector.broadcast %cst_32 : f32 to vector<8x128xf32>
    %65 = arith.addf %64, %63 : vector<8x128xf32>
    %66 = arith.divf %64, %65 : vector<8x128xf32>
    %67 = vector.extract_strided_slice %54 {offsets = [0, 256], sizes = [8, 128], strides = [1, 1]} : vector<8x512xf32> to vector<8x128xf32>
    %68 = math.tanh %67 : vector<8x128xf32>
    %69 = vector.extract_strided_slice %54 {offsets = [0, 384], sizes = [8, 128], strides = [1, 1]} : vector<8x512xf32> to vector<8x128xf32>
    %70 = arith.negf %69 : vector<8x128xf32>
    %71 = math.exp %70 : vector<8x128xf32>
    %cst_33 = arith.constant 1.000000e+00 : f32
    %72 = vector.broadcast %cst_33 : f32 to vector<8x128xf32>
    %73 = arith.addf %72, %71 : vector<8x128xf32>
    %74 = arith.divf %72, %73 : vector<8x128xf32>
    %75 = arith.mulf %66, %43 : vector<8x128xf32>
    %76 = arith.mulf %60, %68 : vector<8x128xf32>
    %77 = arith.addf %75, %76 : vector<8x128xf32>
    %78 = math.tanh %77 : vector<8x128xf32>
    %79 = arith.mulf %74, %78 : vector<8x128xf32>
    %c1_34 = arith.constant 1 : index
    %c0_35 = arith.constant 0 : index
    %c0_36 = arith.constant 0 : index
    %80 = vector.load %arg6[%c1_34, %c0_35, %c0_36] : memref<4x8x128xf32, #tpu.memory_space<vmem>>, vector<1x8x128xf32>
    %81 = vector.shape_cast %80 : vector<1x8x128xf32> to vector<8x128xf32>
    %82 = vector.shape_cast %79 : vector<8x128xf32> to vector<1x8x128xf32>
    tpu.vector_store %arg6[%c1_34, %c0_35, %c0_36], %82 {strides = array<i32>} : memref<4x8x128xf32, #tpu.memory_space<vmem>>, vector<1x8x128xf32>,
    %c2 = arith.constant 2 : index
    %c0_37 = arith.constant 0 : index
    %c0_38 = arith.constant 0 : index
    %83 = vector.load %arg7[%c2, %c0_37, %c0_38] : memref<4x8x512xf32, #tpu.memory_space<vmem>>, vector<1x8x512xf32>
    %84 = vector.shape_cast %83 : vector<1x8x512xf32> to vector<8x512xf32>
    %85 = arith.truncf %79 : vector<8x128xf32> to vector<8x128xbf16>
    %c0_39 = arith.constant 0 : index
    %c0_40 = arith.constant 0 : index
    %86 = vector.load %arg4[%c0_39, %c0_40] : memref<128x512xbf16, #tpu.memory_space<vmem>>, vector<128x512xbf16>
    %cst_41 = arith.constant dense<0.000000e+00> : vector<8x512xf32>
    %87 = tpu.matmul %85, %86, %cst_41 {dimension_numbers = #tpu.dot_dimension_numbers<[1], [0], [0], [1], [0, 0, 1, 1], [], []>} : vector<8x128xbf16>, vector<128x512xbf16>, vector<8x512xf32> -> vector<8x512xf32>
    %88 = arith.addf %84, %87 : vector<8x512xf32>
    %89 = vector.extract_strided_slice %88 {offsets = [0, 0], sizes = [8, 128], strides = [1, 1]} : vector<8x512xf32> to vector<8x128xf32>
    %90 = arith.negf %89 : vector<8x128xf32>
    %91 = math.exp %90 : vector<8x128xf32>
    %cst_42 = arith.constant 1.000000e+00 : f32
    %92 = vector.broadcast %cst_42 : f32 to vector<8x128xf32>
    %93 = arith.addf %92, %91 : vector<8x128xf32>
    %94 = arith.divf %92, %93 : vector<8x128xf32>
    %95 = vector.extract_strided_slice %88 {offsets = [0, 128], sizes = [8, 128], strides = [1, 1]} : vector<8x512xf32> to vector<8x128xf32>
    %96 = arith.negf %95 : vector<8x128xf32>
    %97 = math.exp %96 : vector<8x128xf32>
    %cst_43 = arith.constant 1.000000e+00 : f32
    %98 = vector.broadcast %cst_43 : f32 to vector<8x128xf32>
    %99 = arith.addf %98, %97 : vector<8x128xf32>
    %100 = arith.divf %98, %99 : vector<8x128xf32>
    %101 = vector.extract_strided_slice %88 {offsets = [0, 256], sizes = [8, 128], strides = [1, 1]} : vector<8x512xf32> to vector<8x128xf32>
    %102 = math.tanh %101 : vector<8x128xf32>
    %103 = vector.extract_strided_slice %88 {offsets = [0, 384], sizes = [8, 128], strides = [1, 1]} : vector<8x512xf32> to vector<8x128xf32>
    %104 = arith.negf %103 : vector<8x128xf32>
    %105 = math.exp %104 : vector<8x128xf32>
    %cst_44 = arith.constant 1.000000e+00 : f32
    %106 = vector.broadcast %cst_44 : f32 to vector<8x128xf32>
    %107 = arith.addf %106, %105 : vector<8x128xf32>
    %108 = arith.divf %106, %107 : vector<8x128xf32>
    %109 = arith.mulf %100, %77 : vector<8x128xf32>
    %110 = arith.mulf %94, %102 : vector<8x128xf32>
    %111 = arith.addf %109, %110 : vector<8x128xf32>
    %112 = math.tanh %111 : vector<8x128xf32>
    %113 = arith.mulf %108, %112 : vector<8x128xf32>
    %c2_45 = arith.constant 2 : index
    %c0_46 = arith.constant 0 : index
    %c0_47 = arith.constant 0 : index
    %114 = vector.load %arg6[%c2_45, %c0_46, %c0_47] : memref<4x8x128xf32, #tpu.memory_space<vmem>>, vector<1x8x128xf32>
    %115 = vector.shape_cast %114 : vector<1x8x128xf32> to vector<8x128xf32>
    %116 = vector.shape_cast %113 : vector<8x128xf32> to vector<1x8x128xf32>
    tpu.vector_store %arg6[%c2_45, %c0_46, %c0_47], %116 {strides = array<i32>} : memref<4x8x128xf32, #tpu.memory_space<vmem>>, vector<1x8x128xf32>,
    %c3 = arith.constant 3 : index
    %c0_48 = arith.constant 0 : index
    %c0_49 = arith.constant 0 : index
    %117 = vector.load %arg7[%c3, %c0_48, %c0_49] : memref<4x8x512xf32, #tpu.memory_space<vmem>>, vector<1x8x512xf32>
    %118 = vector.shape_cast %117 : vector<1x8x512xf32> to vector<8x512xf32>
    %119 = arith.truncf %113 : vector<8x128xf32> to vector<8x128xbf16>
    %c0_50 = arith.constant 0 : index
    %c0_51 = arith.constant 0 : index
    %120 = vector.load %arg4[%c0_50, %c0_51] : memref<128x512xbf16, #tpu.memory_space<vmem>>, vector<128x512xbf16>
    %cst_52 = arith.constant dense<0.000000e+00> : vector<8x512xf32>
    %121 = tpu.matmul %119, %120, %cst_52 {dimension_numbers = #tpu.dot_dimension_numbers<[1], [0], [0], [1], [0, 0, 1, 1], [], []>} : vector<8x128xbf16>, vector<128x512xbf16>, vector<8x512xf32> -> vector<8x512xf32>
    %122 = arith.addf %118, %121 : vector<8x512xf32>
    %123 = vector.extract_strided_slice %122 {offsets = [0, 0], sizes = [8, 128], strides = [1, 1]} : vector<8x512xf32> to vector<8x128xf32>
    %124 = arith.negf %123 : vector<8x128xf32>
    %125 = math.exp %124 : vector<8x128xf32>
    %cst_53 = arith.constant 1.000000e+00 : f32
    %126 = vector.broadcast %cst_53 : f32 to vector<8x128xf32>
    %127 = arith.addf %126, %125 : vector<8x128xf32>
    %128 = arith.divf %126, %127 : vector<8x128xf32>
    %129 = vector.extract_strided_slice %122 {offsets = [0, 128], sizes = [8, 128], strides = [1, 1]} : vector<8x512xf32> to vector<8x128xf32>
    %130 = arith.negf %129 : vector<8x128xf32>
    %131 = math.exp %130 : vector<8x128xf32>
    %cst_54 = arith.constant 1.000000e+00 : f32
    %132 = vector.broadcast %cst_54 : f32 to vector<8x128xf32>
    %133 = arith.addf %132, %131 : vector<8x128xf32>
    %134 = arith.divf %132, %133 : vector<8x128xf32>
    %135 = vector.extract_strided_slice %122 {offsets = [0, 256], sizes = [8, 128], strides = [1, 1]} : vector<8x512xf32> to vector<8x128xf32>
    %136 = math.tanh %135 : vector<8x128xf32>
    %137 = vector.extract_strided_slice %122 {offsets = [0, 384], sizes = [8, 128], strides = [1, 1]} : vector<8x512xf32> to vector<8x128xf32>
    %138 = arith.negf %137 : vector<8x128xf32>
    %139 = math.exp %138 : vector<8x128xf32>
    %cst_55 = arith.constant 1.000000e+00 : f32
    %140 = vector.broadcast %cst_55 : f32 to vector<8x128xf32>
    %141 = arith.addf %140, %139 : vector<8x128xf32>
    %142 = arith.divf %140, %141 : vector<8x128xf32>
    %143 = arith.mulf %134, %111 : vector<8x128xf32>
    %144 = arith.mulf %128, %136 : vector<8x128xf32>
    %145 = arith.addf %143, %144 : vector<8x128xf32>
    %146 = math.tanh %145 : vector<8x128xf32>
    %147 = arith.mulf %142, %146 : vector<8x128xf32>
    %c3_56 = arith.constant 3 : index
    %c0_57 = arith.constant 0 : index
    %c0_58 = arith.constant 0 : index
    %148 = vector.load %arg6[%c3_56, %c0_57, %c0_58] : memref<4x8x128xf32, #tpu.memory_space<vmem>>, vector<1x8x128xf32>
    %149 = vector.shape_cast %148 : vector<1x8x128xf32> to vector<8x128xf32>
    %150 = vector.shape_cast %147 : vector<8x128xf32> to vector<1x8x128xf32>
    tpu.vector_store %arg6[%c3_56, %c0_57, %c0_58], %150 {strides = array<i32>} : memref<4x8x128xf32, #tpu.memory_space<vmem>>, vector<1x8x128xf32>,
    %c0_59 = arith.constant 0 : index
    %c0_60 = arith.constant 0 : index
    %151 = vector.load %arg8[%c0_59, %c0_60] : memref<8x128xf32, #tpu.memory_space<vmem>>, vector<8x128xf32>
    tpu.vector_store %arg8[%c0_59, %c0_60], %147 {strides = array<i32>} : memref<8x128xf32, #tpu.memory_space<vmem>>, vector<8x128xf32>,
    %c0_61 = arith.constant 0 : index
    %c0_62 = arith.constant 0 : index
    %152 = vector.load %arg9[%c0_61, %c0_62] : memref<8x128xf32, #tpu.memory_space<vmem>>, vector<8x128xf32>
    tpu.vector_store %arg9[%c0_61, %c0_62], %145 {strides = array<i32>} : memref<8x128xf32, #tpu.memory_space<vmem>>, vector<8x128xf32>,
    return
  }
  func.func @transform_0(%arg0: i32, %arg1: i32) -> (i32, i32, i32) {
    %c0_i32 = arith.constant 0 : i32
    %c0_i32_0 = arith.constant 0 : i32
    return %arg1, %arg0, %c0_i32 : i32, i32, i32
  }
  func.func @transform_1(%arg0: i32, %arg1: i32) -> (i32, i32) {
    %c0_i32 = arith.constant 0 : i32
    %c0_i32_0 = arith.constant 0 : i32
    %c0_i32_1 = arith.constant 0 : i32
    return %c0_i32, %c0_i32_0 : i32, i32
  }
  func.func @transform_2(%arg0: i32, %arg1: i32) -> (i32, i32) {
    %c0_i32 = arith.constant 0 : i32
    %c0_i32_0 = arith.constant 0 : i32
    %c0_i32_1 = arith.constant 0 : i32
    return %c0_i32, %c0_i32_0 : i32, i32
  }
  func.func @transform_3(%arg0: i32, %arg1: i32) -> (i32, i32) {
    %c0_i32 = arith.constant 0 : i32
    %c0_i32_0 = arith.constant 0 : i32
    %c0_i32_1 = arith.constant 0 : i32
    return %c0_i32, %c0_i32_0 : i32, i32
  }
  func.func @transform_4(%arg0: i32, %arg1: i32) -> (i32, i32, i32) {
    %c0_i32 = arith.constant 0 : i32
    %c0_i32_0 = arith.constant 0 : i32
    return %arg1, %arg0, %c0_i32 : i32, i32, i32
  }
}

module attributes {stable_mosaic.version = 11 : i64} {
  func.func @_proj_kernel(%arg0: i32, %arg1: i32, %arg2: memref<16x128xf32, #tpu.memory_space<vmem>>, %arg3: memref<128x256xbf16, #tpu.memory_space<vmem>>, %arg4: memref<1x256xf32, #tpu.memory_space<vmem>>, %arg5: memref<16x256xf32, #tpu.memory_space<vmem>>) attributes {dimension_semantics = [#tpu.dimension_semantics<parallel>, #tpu.dimension_semantics<parallel>], iteration_bounds = array<i64: 5, 1>, scalar_prefetch = 0 : i64, scratch_operands = 0 : i64, tpu.core_type = #tpu.core_type<tc>, window_params = [{transform_indices = @transform_0, window_bounds = array<i64: 16, 128>}, {transform_indices = @transform_1, window_bounds = array<i64: 128, 256>}, {transform_indices = @transform_2, window_bounds = array<i64: 1, 256>}, {transform_indices = @transform_3, window_bounds = array<i64: 16, 256>}]} {
    %c0 = arith.constant 0 : index
    %c0_0 = arith.constant 0 : index
    %0 = vector.load %arg2[%c0, %c0_0] : memref<16x128xf32, #tpu.memory_space<vmem>>, vector<16x128xf32>
    %1 = arith.truncf %0 : vector<16x128xf32> to vector<16x128xbf16>
    %c0_1 = arith.constant 0 : index
    %c0_2 = arith.constant 0 : index
    %2 = vector.load %arg3[%c0_1, %c0_2] : memref<128x256xbf16, #tpu.memory_space<vmem>>, vector<128x256xbf16>
    %cst = arith.constant dense<0.000000e+00> : vector<16x256xf32>
    %3 = tpu.matmul %1, %2, %cst {dimension_numbers = #tpu.dot_dimension_numbers<[1], [0], [0], [1], [0, 0, 1, 1], [], []>} : vector<16x128xbf16>, vector<128x256xbf16>, vector<16x256xf32> -> vector<16x256xf32>
    %c0_3 = arith.constant 0 : index
    %c0_4 = arith.constant 0 : index
    %4 = vector.load %arg4[%c0_3, %c0_4] : memref<1x256xf32, #tpu.memory_space<vmem>>, vector<1x256xf32>
    %5 = vector.broadcast %4 : vector<1x256xf32> to vector<16x256xf32>
    %6 = arith.addf %3, %5 : vector<16x256xf32>
    %c0_5 = arith.constant 0 : index
    %c0_6 = arith.constant 0 : index
    %7 = vector.load %arg5[%c0_5, %c0_6] : memref<16x256xf32, #tpu.memory_space<vmem>>, vector<16x256xf32>
    tpu.vector_store %arg5[%c0_5, %c0_6], %6 {strides = array<i32>} : memref<16x256xf32, #tpu.memory_space<vmem>>, vector<16x256xf32>,
    return
  }
  func.func @transform_0(%arg0: i32, %arg1: i32) -> (i32, i32) {
    %c0_i32 = arith.constant 0 : i32
    %c0_i32_0 = arith.constant 0 : i32
    return %arg0, %c0_i32 : i32, i32
  }
  func.func @transform_1(%arg0: i32, %arg1: i32) -> (i32, i32) {
    %c0_i32 = arith.constant 0 : i32
    %c0_i32_0 = arith.constant 0 : i32
    return %c0_i32, %arg1 : i32, i32
  }
  func.func @transform_2(%arg0: i32, %arg1: i32) -> (i32, i32) {
    %c0_i32 = arith.constant 0 : i32
    %c0_i32_0 = arith.constant 0 : i32
    return %c0_i32, %arg1 : i32, i32
  }
  func.func @transform_3(%arg0: i32, %arg1: i32) -> (i32, i32) {
    %c0_i32 = arith.constant 0 : i32
    return %arg0, %arg1 : i32, i32
  }
}

</mosaic_0001>

<bundles_post_ra>
// kernel: decoder_rnn_forward.3
= control target key start
LH: loop header
LB: loop body
LE: loop exit
PB: predicated region body
PF: predicated region fallthrough
CT: control target
= control target key end

     0   :  { %s635_s12 = smov 0   ;;  %s637_s13 = smov 0   ;;  %s722_s0 = inlined_call_operand.vmem [shape: f32[80,128], index: 0, kind: input, shape index: {}]   ;;  %s723_s1 = inlined_call_operand.vmem [shape: bf16[128,256], index: 1, kind: input, shape index: {}]   ;;  %s724_s2 = inlined_call_operand.vmem [shape: f32[1,256], index: 2, kind: input, shape index: {}]   ;;  %s725_s3 = inlined_call_operand.vmem [shape: f32[80,256], index: 3, kind: output, shape index: {}]  }
   0x1   :  { %s639_s14 = smov 0  }
   0x2 LB: > { %s25_s15 = sadd.s32 1, %s608_s13  ;;  %p516_p0 = scmp.ge.s32.totalorder %s612_s14, 1  ;;  %s612_s14 = sphi %s639_s14, %s13_s14   ;;  %s608_s13 = sphi %s637_s13, %s727_s13   ;;  %s604_s12 = sphi %s635_s12, %s726_s12  }
   0x3   : > { %p27_p1 = scmp.ge.s32.totalorder %s25_s15, 5  ;;  %p173_p2 = scmp.lt.s32.totalorder %s612_s14, 6 }
   0x5   : > { %s729_s15 = smov (%p27_p1, %s25_s15), 0  ;;  %p174_p3 = pnand %p516_p0, %p173_p2 }
   0x6   : > { %v566_v0 = vld [vmem:[%s723_s1 + $0x4] ss:$8 sps:$4 sm:$0xff] (!%p174_p3)   ;;  %v568_v1 = vld [vmem:[%s723_s1] ss:$8 sps:$4 sm:$0xff] (!%p174_p3)   ;;  %v614_v2 = vmov (!%p174_p3), 0   ;;  %s517_s30 = sshll.u32 (!%p174_p3), %s604_s12, 1  ;;  %v262_v20 = vlaneseq (!%p174_p3) }
   0x7   : > { %177 = sbr.rel (%p174_p3) target bundleno = 257 (0x101), region = 32  ;;  %384 = vmatprep.mubr.bf16.mxu0 (!%p174_p3), %v614_v2  ;;  %352 = vmatprep.subr.bf16.mxu0 (!%p174_p3), %v566_v0  ;;  %v569_v3 = vld [vmem:[%s723_s1 + $0x14] ss:$8 sps:$4 sm:$0xff] (!%p174_p3)   ;;  %v571_v4 = vld [vmem:[%s723_s1 + $0x10] ss:$8 sps:$4 sm:$0xff] (!%p174_p3)   ;;  %p212_p4 = scmp.lt.s32.totalorder (!%p174_p3), %s517_s30, 9 }
   0x8   : > { %353 = vmatpush1.bf16.msra.mxu0 (!%p174_p3), %v568_v1  ;;  %v572_v5 = vld [vmem:[%s723_s1 + $0x24] ss:$8 sps:$4 sm:$0xff] (!%p174_p3)   ;;  %v574_v6 = vld [vmem:[%s723_s1 + $0x20] ss:$8 sps:$4 sm:$0xff] (!%p174_p3)   ;;  %v575_v7 = vld [vmem:[%s723_s1 + $0x34] ss:$8 sps:$4 sm:$0xff] (!%p174_p3)  }
   0x9   : > { %354 = vmatprep.subr.bf16.mxu0 (!%p174_p3), %v569_v3  ;;  %v577_v8 = vld [vmem:[%s723_s1 + $0x30] ss:$8 sps:$4 sm:$0xff] (!%p174_p3)   ;;  %v578_v9 = vld [vmem:[%s723_s1 + $0x44] ss:$8 sps:$4 sm:$0xff] (!%p174_p3)   ;;  %v580_v10 = vld [vmem:[%s723_s1 + $0x40] ss:$8 sps:$4 sm:$0xff] (!%p174_p3)  }
   0xa   : > { %v581_v11 = vld [vmem:[%s723_s1 + $0x54] ss:$8 sps:$4 sm:$0xff] (!%p174_p3)   ;;  %v583_v12 = vld [vmem:[%s723_s1 + $0x50] ss:$8 sps:$4 sm:$0xff] (!%p174_p3)   ;;  %v584_v13 = vld [vmem:[%s723_s1 + $0x64] ss:$8 sps:$4 sm:$0xff] (!%p174_p3)  }
   0xb   : > { %v586_v14 = vld [vmem:[%s723_s1 + $0x60] ss:$8 sps:$4 sm:$0xff] (!%p174_p3)   ;;  %v587_v15 = vld [vmem:[%s723_s1 + $0x74] ss:$8 sps:$4 sm:$0xff] (!%p174_p3)   ;;  %v589_v16 = vld [vmem:[%s723_s1 + $0x70] ss:$8 sps:$4 sm:$0xff] (!%p174_p3)  }
   0xc   : > { %355 = vmatpush1.bf16.msra.mxu0 (!%p174_p3), %v571_v4  ;;  %v263_v21 = vshrl.u32 (!%p174_p3), %v262_v20, 7  ;;  %v260_v23 = vld [vmem:[%s724_s2] sm:$0x3] (!%p174_p3) }
   0xd   : > { %356 = vmatprep.subr.bf16.mxu0 (!%p174_p3), %v572_v5 }
   0xe   : > { %s731_s30 = smov (!%p212_p4, %s517_s30), 9  ;;  %v264_v22 = vsub.s32 0, %v263_v21  ;;  %v268_v24 = vsub.s32 1, %v263_v21 }
   0xf   : > { %s518_s19 = sshll.u32 %s731_s30, 3  ;;  %s540_s5 = sshll.u32 %s731_s30, 4 }
  0x10   : > { %357 = vmatpush1.bf16.msra.mxu0 %v574_v6  ;;  %s215_s26 = scalar_lea.vmem %s722_s0, %s518_s19  ;;  %v265_v25 = vrot.slane %v260_v23, %v264_v22  ;;  %v269_v26 = vrot.slane %v260_v23, %v268_v24  ;;  %s237_s8 = scalar_lea.vmem %s725_s3, %s540_s5 }
  0x11   : > { %358 = vmatprep.subr.bf16.mxu0 %v575_v7  ;;  %v241_v17 = vld [vmem:[%s215_s26] sm:$0xff]  ;;  %v242_v18 = vld [vmem:[%s215_s26 + $0x8] sm:$0xff] }
  0x12   : > { %v243_v19 = vpack.c.bf16 %v242_v18, %v241_v17 }
  0x14   : > { %359 = vmatpush1.bf16.msra.mxu0 %v577_v8 }
  0x15   : > { %360 = vmatprep.subr.bf16.mxu0 %v578_v9 }
  0x18   : > { %361 = vmatpush1.bf16.msra.mxu0 %v580_v10 }
  0x19   : > { %362 = vmatprep.subr.bf16.mxu0 %v581_v11 }
  0x1c   : > { %363 = vmatpush1.bf16.msra.mxu0 %v583_v12 }
  0x1d   : > { %364 = vmatprep.subr.bf16.mxu0 %v584_v13 }
  0x20   : > { %365 = vmatpush1.bf16.msra.mxu0 %v586_v14 }
  0x21   : > { %366 = vmatprep.subr.bf16.mxu0 %v587_v15 }
  0x24   : > { %367 = vmatpush1.bf16.msra.mxu0 %v589_v16 }
  0x27   : > { %385 = vmatmul.mubr.bf16.vlgmr.msra.gmra.mrb[0].mxu0 %v243_v19 }
  0xfa   : > { %v386_v27 = vpop.f32.mrb[0].mxu0 }
  0xfb   : > { %v387_v28 = vadd.f32 %v386_v27, %v265_v25  ;;  %v388_v29 = vpop.f32.mrb[1].mxu0 }
  0xfc   : > { %v389_v30 = vadd.f32 %v388_v29, %v269_v26  ;;  %v390_v31 = vpop.f32.mrb[2].mxu0 }
  0xfd   : > { %395 = vst [vmem:[%s237_s8] sm:$0xff] %v387_v28  ;;  %v391_v32 = vadd.f32 %v390_v31, %v265_v25  ;;  %v392_v33 = vpop.f32.mrb[3].mxu0 }
  0xfe   : > { %396 = vst [vmem:[%s237_s8 + $0x8] sm:$0xff] %v389_v30  ;;  %v393_v34 = vadd.f32 %v392_v33, %v269_v26 }
  0xff   : > { %397 = vst [vmem:[%s237_s8 + $0x10] sm:$0xff] %v391_v32 }
 0x100   : > { %398 = vst [vmem:[%s237_s8 + $0x18] sm:$0xff] %v393_v34 }
 0x101 PF: > { %s13_s14 = sadd.s32 1, %s612_s14   ;;  %s726_s12 = smov %s608_s13 }
 0x102   : > { %p10_p5 = scmp.ge.s32.totalorder %s13_s14, 7   ;;  %s727_s13 = smov %s729_s15 }
 0x104   :  { %12 = sbr.rel (!%p10_p5) target bundleno = 2 (0x2), region = 68 }

// kernel: decoder_rnn_forward.2
= control target key start
LH: loop header
LB: loop body
LE: loop exit
PB: predicated region body
PF: predicated region fallthrough
CT: control target
= control target key end

     0   :  { %s2325_s15 = smov 0   ;;  %s2327_s16 = smov 0   ;;  %s2813_s0 = inlined_call_operand.vmem [shape: f32[12,8,128], index: 0, kind: input, shape index: {}]   ;;  %s2814_s1 = inlined_call_operand.vmem [shape: bf16[128,512], index: 1, kind: input, shape index: {}]   ;;  %s2815_s2 = inlined_call_operand.vmem [shape: bf16[128,512], index: 2, kind: input, shape index: {}]   ;;  %s2816_s3 = inlined_call_operand.vmem [shape: f32[1,512], index: 3, kind: input, shape index: {}]   ;;  %s2817_s4 = inlined_call_operand.vmem [shape: f32[12,8,128], index: 4, kind: output, shape index: {}]  }
   0x1   :  { %s2329_s17 = smov 0  }
   0x2 LB: > { %s23_s18 = sadd.s32 1, %s2292_s16  ;;  %p1905_p0 = scmp.ge.s32.totalorder %s2296_s17, 1  ;;  %s2296_s17 = sphi %s2329_s17, %s14_s17   ;;  %s2292_s16 = sphi %s2327_s16, %s2836_s16   ;;  %s2288_s15 = sphi %s2325_s15, %s2835_s15  }
   0x3   : > { %p24_p1 = scmp.ge.s32.totalorder %s23_s18, 3  ;;  %p182_p2 = scmp.lt.s32.totalorder %s2296_s17, 4 }
   0x5   : > { %s2838_s18 = smov (%p24_p1, %s23_s18), 0  ;;  %p183_p3 = pnand %p1905_p0, %p182_p2 }
   0x7   : > { %186 = sbr.rel (%p183_p3) target bundleno = 1128 (0x468), region = 36 }
   0xe   : > { %s1906_s19 = sshll.u32 %s2288_s15, 2  ;;  %p1910_p5 = scmp.ne.s32.totalorder %s2288_s15, 0 }
   0xf   : > { %p215_p4 = scmp.lt.s32.totalorder %s1906_s19, 11  ;;  %v2298_v0 = vmov (!%p1910_p5), 0.0  }
  0x10   : > { %236 = sbr.rel (%p1910_p5) target bundleno = 23 (0x17), region = 40  ;;  %237 = vst [vmem:[#allocation3] sm:$0xff] (!%p1910_p5), %v2298_v0  ;;  %238 = vst [vmem:[#allocation4] sm:$0xff] (!%p1910_p5), %v2298_v0 }
  0x11   : > { %s2840_s19 = smov (!%p215_p4, %s1906_s19), 11 }
  0x12   : > { %s1907_s20 = sshll.u32 %s2840_s19, 3 }
  0x13   : > { %s2346_s23 = scalar_lea.vmem %s2813_s0, %s1907_s20  ;;  %s2351_s26 = scalar_lea.vmem %s2817_s4, %s1907_s20 }
  0x17 PF: > { %v2114_v1 = vld [vmem:[%s2814_s1 + $0x4] ss:$16 sps:$4 sm:$0xff]   ;;  %v2116_v2 = vld [vmem:[%s2814_s1 + $0xc] ss:$16 sps:$4 sm:$0xff]   ;;  %v2818_v3 = vmov 0  }
  0x18   : > { %491 = vmatprep.mubr.bf16.mxu0 %v2818_v3  ;;  %544 = vmatprep.mubr.bf16.mxu1 %v2818_v3  ;;  %v2118_v4 = vld [vmem:[%s2814_s1] ss:$16 sps:$4 sm:$0xff]   ;;  %v2119_v5 = vld [vmem:[%s2814_s1 + $0x8] ss:$16 sps:$4 sm:$0xff]   ;;  %v2120_v6 = vld [vmem:[%s2814_s1 + $0x24] ss:$16 sps:$4 sm:$0xff]  }
  0x19   : > { %459 = vmatprep.subr.bf16.mxu0 %v2114_v1  ;;  %512 = vmatprep.subr.bf16.mxu1 %v2116_v2  ;;  %v2122_v7 = vld [vmem:[%s2814_s1 + $0x2c] ss:$16 sps:$4 sm:$0xff]   ;;  %v2124_v8 = vld [vmem:[%s2814_s1 + $0x20] ss:$16 sps:$4 sm:$0xff]   ;;  %v2125_v9 = vld [vmem:[%s2814_s1 + $0x28] ss:$16 sps:$4 sm:$0xff]  }
  0x1a   : > { %460 = vmatpush1.bf16.msra.mxu0 %v2118_v4  ;;  %513 = vmatpush1.bf16.msra.mxu1 %v2119_v5  ;;  %v2126_v10 = vld [vmem:[%s2814_s1 + $0x44] ss:$16 sps:$4 sm:$0xff]   ;;  %v2128_v11 = vld [vmem:[%s2814_s1 + $0x4c] ss:$16 sps:$4 sm:$0xff]   ;;  %v2130_v12 = vld [vmem:[%s2814_s1 + $0x40] ss:$16 sps:$4 sm:$0xff]  }
  0x1b   : > { %461 = vmatprep.subr.bf16.mxu0 %v2120_v6  ;;  %514 = vmatprep.subr.bf16.mxu1 %v2122_v7  ;;  %v2131_v13 = vld [vmem:[%s2814_s1 + $0x48] ss:$16 sps:$4 sm:$0xff]   ;;  %v2132_v14 = vld [vmem:[%s2814_s1 + $0x64] ss:$16 sps:$4 sm:$0xff]   ;;  %v2134_v15 = vld [vmem:[%s2814_s1 + $0x6c] ss:$16 sps:$4 sm:$0xff]  }
  0x1c   : > { %v2136_v16 = vld [vmem:[%s2814_s1 + $0x60] ss:$16 sps:$4 sm:$0xff]   ;;  %v2137_v17 = vld [vmem:[%s2814_s1 + $0x68] ss:$16 sps:$4 sm:$0xff]   ;;  %v2138_v18 = vld [vmem:[%s2814_s1 + $0x84] ss:$16 sps:$4 sm:$0xff]  }
  0x1d   : > { %v2140_v19 = vld [vmem:[%s2814_s1 + $0x8c] ss:$16 sps:$4 sm:$0xff]   ;;  %v2142_v20 = vld [vmem:[%s2814_s1 + $0x80] ss:$16 sps:$4 sm:$0xff]   ;;  %v2143_v21 = vld [vmem:[%s2814_s1 + $0x88] ss:$16 sps:$4 sm:$0xff]  }
  0x1e   : > { %462 = vmatpush1.bf16.msra.mxu0 %v2124_v8  ;;  %515 = vmatpush1.bf16.msra.mxu1 %v2125_v9  ;;  %v2144_v22 = vld [vmem:[%s2814_s1 + $0xa4] ss:$16 sps:$4 sm:$0xff]   ;;  %v2146_v23 = vld [vmem:[%s2814_s1 + $0xac] ss:$16 sps:$4 sm:$0xff]   ;;  %v2148_v24 = vld [vmem:[%s2814_s1 + $0xa0] ss:$16 sps:$4 sm:$0xff]  }
  0x1f   : > { %463 = vmatprep.subr.bf16.mxu0 %v2126_v10  ;;  %516 = vmatprep.subr.bf16.mxu1 %v2128_v11  ;;  %v2149_v25 = vld [vmem:[%s2814_s1 + $0xa8] ss:$16 sps:$4 sm:$0xff]   ;;  %v2150_v26 = vld [vmem:[%s2814_s1 + $0xc4] ss:$16 sps:$4 sm:$0xff]   ;;  %v2152_v27 = vld [vmem:[%s2814_s1 + $0xcc] ss:$16 sps:$4 sm:$0xff]   ;;  %v279_v11 = vlaneseq }
  0x20   : > { %v2154_v28 = vld [vmem:[%s2814_s1 + $0xc0] ss:$16 sps:$4 sm:$0xff]   ;;  %v2155_v29 = vld [vmem:[%s2814_s1 + $0xc8] ss:$16 sps:$4 sm:$0xff]   ;;  %v2156_v30 = vld [vmem:[%s2814_s1 + $0xe4] ss:$16 sps:$4 sm:$0xff]  }
  0x21   : > { %v2158_v31 = vld [vmem:[%s2814_s1 + $0xec] ss:$16 sps:$4 sm:$0xff]   ;;  %v2160_v32 = vld [vmem:[%s2814_s1 + $0xe0] ss:$16 sps:$4 sm:$0xff]   ;;  %v2161_v33 = vld [vmem:[%s2814_s1 + $0xe8] ss:$16 sps:$4 sm:$0xff]  }
  0x22   : > { %464 = vmatpush1.bf16.msra.mxu0 %v2130_v12  ;;  %517 = vmatpush1.bf16.msra.mxu1 %v2131_v13  ;;  %v239_v34 = vld [vmem:[%s2346_s23] sm:$0xff]  ;;  %v240_v35 = vld [vmem:[%s2346_s23 + $0x8] sm:$0xff]  ;;  %v241_v47 = vld [vmem:[%s2346_s23 + $0x10] sm:$0xff]  ;;  %v280_v12 = vshrl.u32 %v279_v11, 7 }
  0x23   : > { %465 = vmatprep.subr.bf16.mxu0 %v2132_v14  ;;  %518 = vmatprep.subr.bf16.mxu1 %v2134_v15  ;;  %v2456_v36 = vld [vmem:[%s2815_s2 + $0x4] ss:$16 sps:$4 sm:$0xff]   ;;  %v2461_v37 = vld [vmem:[%s2815_s2 + $0xc] ss:$16 sps:$4 sm:$0xff]   ;;  %v243_v38 = vpack.c.bf16 %v240_v35, %v239_v34  ;;  %v2466_v39 = vld [vmem:[%s2815_s2] ss:$16 sps:$4 sm:$0xff]  }
  0x24   : > { %v2471_v40 = vld [vmem:[%s2815_s2 + $0x8] ss:$16 sps:$4 sm:$0xff]   ;;  %v2478_v41 = vld [vmem:[%s2815_s2 + $0x24] ss:$16 sps:$4 sm:$0xff]   ;;  %v2483_v42 = vld [vmem:[%s2815_s2 + $0x2c] ss:$16 sps:$4 sm:$0xff]  }
  0x25   : > { %v2490_v43 = vld [vmem:[%s2815_s2 + $0x20] ss:$16 sps:$4 sm:$0xff]   ;;  %v2495_v44 = vld [vmem:[%s2815_s2 + $0x28] ss:$16 sps:$4 sm:$0xff]   ;;  %v2502_v45 = vld [vmem:[%s2815_s2 + $0x44] ss:$16 sps:$4 sm:$0xff]  }
  0x26   : > { %466 = vmatpush1.bf16.msra.mxu0 %v2136_v16  ;;  %519 = vmatpush1.bf16.msra.mxu1 %v2137_v17  ;;  %v2507_v46 = vld [vmem:[%s2815_s2 + $0x4c] ss:$16 sps:$4 sm:$0xff]   ;;  %v2516_v49 = vld [vmem:[%s2815_s2 + $0x40] ss:$16 sps:$4 sm:$0xff]   ;;  %v2521_v50 = vld [vmem:[%s2815_s2 + $0x48] ss:$16 sps:$4 sm:$0xff]  }
  0x27   : > { %467 = vmatprep.subr.bf16.mxu0 %v2138_v18  ;;  %520 = vmatprep.subr.bf16.mxu1 %v2140_v19  ;;  %v242_v48 = vld [vmem:[%s2346_s23 + $0x18] sm:$0xff]  ;;  %v2528_v52 = vld [vmem:[%s2815_s2 + $0x64] ss:$16 sps:$4 sm:$0xff]   ;;  %v2542_v54 = vld [vmem:[%s2815_s2 + $0x60] ss:$16 sps:$4 sm:$0xff]   ;;  %v281_v13 = vsub.s32 0, %v280_v12 }
  0x28   : > { %v244_v51 = vpack.c.bf16 %v242_v48, %v241_v47  ;;  %v2535_v53 = vld [vmem:[%s2815_s2 + $0x6c] ss:$16 sps:$4 sm:$0xff]   ;;  %v2547_v55 = vld [vmem:[%s2815_s2 + $0x68] ss:$16 sps:$4 sm:$0xff]   ;;  %v2554_v56 = vld [vmem:[%s2815_s2 + $0x84] ss:$16 sps:$4 sm:$0xff]  }
  0x29   : > { %v2559_v57 = vld [vmem:[%s2815_s2 + $0x8c] ss:$16 sps:$4 sm:$0xff]   ;;  %v2568_v58 = vld [vmem:[%s2815_s2 + $0x80] ss:$16 sps:$4 sm:$0xff]   ;;  %v2573_v59 = vld [vmem:[%s2815_s2 + $0x88] ss:$16 sps:$4 sm:$0xff]  }
  0x2a   : > { %468 = vmatpush1.bf16.msra.mxu0 %v2142_v20  ;;  %521 = vmatpush1.bf16.msra.mxu1 %v2143_v21  ;;  %v2580_v60 = vld [vmem:[%s2815_s2 + $0xa4] ss:$16 sps:$4 sm:$0xff]   ;;  %v2585_v61 = vld [vmem:[%s2815_s2 + $0xac] ss:$16 sps:$4 sm:$0xff]   ;;  %v2592_v62 = vld [vmem:[%s2815_s2 + $0xa0] ss:$16 sps:$4 sm:$0xff]  }
  0x2b   : > { %469 = vmatprep.subr.bf16.mxu0 %v2144_v22  ;;  %522 = vmatprep.subr.bf16.mxu1 %v2146_v23  ;;  %v2597_v63 = vld [vmem:[%s2815_s2 + $0xa8] ss:$16 sps:$4 sm:$0xff]   ;;  %v2604_v0 = vld [vmem:[%s2815_s2 + $0xc4] ss:$16 sps:$4 sm:$0xff]   ;;  %v2609_v1 = vld [vmem:[%s2815_s2 + $0xcc] ss:$16 sps:$4 sm:$0xff]  }
  0x2c   : > { %v2616_v2 = vld [vmem:[%s2815_s2 + $0xc0] ss:$16 sps:$4 sm:$0xff]   ;;  %v2621_v4 = vld [vmem:[%s2815_s2 + $0xc8] ss:$16 sps:$4 sm:$0xff]   ;;  %v2628_v5 = vld [vmem:[%s2815_s2 + $0xe4] ss:$16 sps:$4 sm:$0xff]  }
  0x2d   : > { %v2633_v6 = vld [vmem:[%s2815_s2 + $0xec] ss:$16 sps:$4 sm:$0xff]   ;;  %v2640_v7 = vld [vmem:[%s2815_s2 + $0xe0] ss:$16 sps:$4 sm:$0xff]   ;;  %v2645_v8 = vld [vmem:[%s2815_s2 + $0xe8] ss:$16 sps:$4 sm:$0xff]  }
  0x2e   : > { %470 = vmatpush1.bf16.msra.mxu0 %v2148_v24  ;;  %523 = vmatpush1.bf16.msra.mxu1 %v2149_v25  ;;  %v581_v9 = vld [vmem:[#allocation3] sm:$0xff]  ;;  %v289_v14 = vsub.s32 2, %v280_v12  ;;  %v293_v16 = vsub.s32 3, %v280_v12  ;;  %v285_v17 = vsub.s32 1, %v280_v12 }
  0x2f   : > { %471 = vmatprep.subr.bf16.mxu0 %v2150_v26  ;;  %524 = vmatprep.subr.bf16.mxu1 %v2152_v27  ;;  %v587_v10 = vpack.c.bf16 %v581_v9, %v581_v9  ;;  %v277_v15 = vld [vmem:[%s2816_s3] sm:$0xf] }
  0x30   : > { %v282_v18 = vrot.slane %v277_v15, %v281_v13  ;;  %v290_v19 = vrot.slane %v277_v15, %v289_v14  ;;  %v294_v22 = vrot.slane %v277_v15, %v293_v16  ;;  %v286_v25 = vrot.slane %v277_v15, %v285_v17 }
  0x32   : > { %472 = vmatpush1.bf16.msra.mxu0 %v2154_v28  ;;  %525 = vmatpush1.bf16.msra.mxu1 %v2155_v29 }
  0x33   : > { %473 = vmatprep.subr.bf16.mxu0 %v2156_v30  ;;  %526 = vmatprep.subr.bf16.mxu1 %v2158_v31 }
  0x36   : > { %474 = vmatpush1.bf16.msra.mxu0 %v2160_v32  ;;  %527 = vmatpush1.bf16.msra.mxu1 %v2161_v33 }
  0x37   : > { %780 = vmatprep.subr.bf16.mxu0 %v2456_v36  ;;  %821 = vmatprep.subr.bf16.mxu1 %v2461_v37 }
  0x39   : > { %492 = vmatmul.mubr.bf16.vlgmr.msra.gmra.mrb[0].mxu0 %v243_v38  ;;  %545 = vmatmul.mubr.bf16.vlgmr.msra.gmra.mrb[0].mxu1 %v243_v38 }
  0x3a   : > { %781 = vmatpush1.bf16.msra.mxu0 %v2466_v39  ;;  %822 = vmatpush1.bf16.msra.mxu1 %v2471_v40 }
  0x3b   : > { %782 = vmatprep.subr.bf16.mxu0 %v2478_v41  ;;  %823 = vmatprep.subr.bf16.mxu1 %v2483_v42 }
  0x3c   : > { %501 = vmatprep.mubr.bf16.mxu0 %v2818_v3  ;;  %554 = vmatprep.mubr.bf16.mxu1 %v2818_v3 }
  0x3e   : > { %783 = vmatpush1.bf16.msra.mxu0 %v2490_v43  ;;  %824 = vmatpush1.bf16.msra.mxu1 %v2495_v44 }
  0x3f   : > { %784 = vmatprep.subr.bf16.mxu0 %v2502_v45  ;;  %825 = vmatprep.subr.bf16.mxu1 %v2507_v46 }
  0x41   : > { %502 = vmatmul.mubr.bf16.gmra.mrb[4].mxu0 %v244_v51  ;;  %555 = vmatmul.mubr.bf16.gmra.mrb[4].mxu1 %v244_v51 }
  0x42   : > { %785 = vmatpush1.bf16.msra.mxu0 %v2516_v49  ;;  %826 = vmatpush1.bf16.msra.mxu1 %v2521_v50 }
  0x43   : > { %786 = vmatprep.subr.bf16.mxu0 %v2528_v52  ;;  %827 = vmatprep.subr.bf16.mxu1 %v2535_v53 }
  0x44   : > { %812 = vmatprep.mubr.bf16.mxu0 %v2818_v3  ;;  %853 = vmatprep.mubr.bf16.mxu1 %v2818_v3 }
  0x46   : > { %787 = vmatpush1.bf16.msra.mxu0 %v2542_v54  ;;  %828 = vmatpush1.bf16.msra.mxu1 %v2547_v55 }
  0x47   : > { %788 = vmatprep.subr.bf16.mxu0 %v2554_v56  ;;  %829 = vmatprep.subr.bf16.mxu1 %v2559_v57 }
  0x4a   : > { %789 = vmatpush1.bf16.msra.mxu0 %v2568_v58  ;;  %830 = vmatpush1.bf16.msra.mxu1 %v2573_v59 }
  0x4b   : > { %790 = vmatprep.subr.bf16.mxu0 %v2580_v60  ;;  %831 = vmatprep.subr.bf16.mxu1 %v2585_v61 }
  0x4e   : > { %791 = vmatpush1.bf16.msra.mxu0 %v2592_v62  ;;  %832 = vmatpush1.bf16.msra.mxu1 %v2597_v63 }
  0x4f   : > { %792 = vmatprep.subr.bf16.mxu0 %v2604_v0  ;;  %833 = vmatprep.subr.bf16.mxu1 %v2609_v1 }
  0x52   : > { %793 = vmatpush1.bf16.msra.mxu0 %v2616_v2  ;;  %834 = vmatpush1.bf16.msra.mxu1 %v2621_v4 }
  0x53   : > { %794 = vmatprep.subr.bf16.mxu0 %v2628_v5  ;;  %835 = vmatprep.subr.bf16.mxu1 %v2633_v6 }
  0x56   : > { %795 = vmatpush1.bf16.msra.mxu0 %v2640_v7  ;;  %836 = vmatpush1.bf16.msra.mxu1 %v2645_v8 }
  0x57   : > { %1089 = vmatprep.subr.bf16.mxu0 %v2456_v36  ;;  %1130 = vmatprep.subr.bf16.mxu1 %v2461_v37 }
  0x59   : > { %813 = vmatmul.mubr.bf16.vlgmr.msra.gmra.mrb[8].mxu0 %v587_v10  ;;  %854 = vmatmul.mubr.bf16.vlgmr.msra.gmra.mrb[8].mxu1 %v587_v10 }
  0x5a   : > { %1090 = vmatpush1.bf16.msra.mxu0 %v2466_v39  ;;  %1131 = vmatpush1.bf16.msra.mxu1 %v2471_v40 }
  0x5b   : > { %1091 = vmatprep.subr.bf16.mxu0 %v2478_v41  ;;  %1132 = vmatprep.subr.bf16.mxu1 %v2483_v42 }
  0x5c   : > { %1121 = vmatprep.mubr.bf16.mxu0 %v2818_v3  ;;  %1162 = vmatprep.mubr.bf16.mxu1 %v2818_v3 }
  0x5e   : > { %1092 = vmatpush1.bf16.msra.mxu0 %v2490_v43  ;;  %1133 = vmatpush1.bf16.msra.mxu1 %v2495_v44 }
  0x5f   : > { %1093 = vmatprep.subr.bf16.mxu0 %v2502_v45  ;;  %1134 = vmatprep.subr.bf16.mxu1 %v2507_v46 }
  0x62   : > { %1094 = vmatpush1.bf16.msra.mxu0 %v2516_v49  ;;  %1135 = vmatpush1.bf16.msra.mxu1 %v2521_v50 }
  0x63   : > { %1095 = vmatprep.subr.bf16.mxu0 %v2528_v52  ;;  %1136 = vmatprep.subr.bf16.mxu1 %v2535_v53 }
  0x66   : > { %1096 = vmatpush1.bf16.msra.mxu0 %v2542_v54  ;;  %1137 = vmatpush1.bf16.msra.mxu1 %v2547_v55 }
  0x67   : > { %1097 = vmatprep.subr.bf16.mxu0 %v2554_v56  ;;  %1138 = vmatprep.subr.bf16.mxu1 %v2559_v57 }
  0x6a   : > { %1098 = vmatpush1.bf16.msra.mxu0 %v2568_v58  ;;  %1139 = vmatpush1.bf16.msra.mxu1 %v2573_v59 }
  0x6b   : > { %1099 = vmatprep.subr.bf16.mxu0 %v2580_v60  ;;  %1140 = vmatprep.subr.bf16.mxu1 %v2585_v61 }
  0x6e   : > { %1100 = vmatpush1.bf16.msra.mxu0 %v2592_v62  ;;  %1141 = vmatpush1.bf16.msra.mxu1 %v2597_v63 }
  0x6f   : > { %1101 = vmatprep.subr.bf16.mxu0 %v2604_v0  ;;  %1142 = vmatprep.subr.bf16.mxu1 %v2609_v1 }
  0x72   : > { %1102 = vmatpush1.bf16.msra.mxu0 %v2616_v2  ;;  %1143 = vmatpush1.bf16.msra.mxu1 %v2621_v4 }
  0x73   : > { %1103 = vmatprep.subr.bf16.mxu0 %v2628_v5  ;;  %1144 = vmatprep.subr.bf16.mxu1 %v2633_v6 }
  0x76   : > { %1104 = vmatpush1.bf16.msra.mxu0 %v2640_v7  ;;  %1145 = vmatpush1.bf16.msra.mxu1 %v2645_v8 }
  0x77   : > { %1399 = vmatprep.subr.bf16.mxu0 %v2456_v36  ;;  %1440 = vmatprep.subr.bf16.mxu1 %v2461_v37 }
 0x10c   : > { %v493_v20 = vpop.f32.mrb[0].mxu0  ;;  %v546_v21 = vpop.f32.mrb[0].mxu1 }
 0x10d   : > { %v495_v23 = vpop.f32.mrb[1].mxu0  ;;  %v548_v24 = vpop.f32.mrb[1].mxu1 }
 0x10e   : > { %v497_v26 = vpop.f32.mrb[2].mxu0  ;;  %v550_v27 = vpop.f32.mrb[2].mxu1 }
 0x10f   : > { %v2690_v28 = vadd.f32 %v497_v26, %v282_v18  ;;  %v499_v29 = vpop.f32.mrb[3].mxu0  ;;  %v2692_v30 = vadd.f32 %v550_v27, %v290_v19  ;;  %v552_v31 = vpop.f32.mrb[3].mxu1  ;;  %v494_v27 = vadd.f32 %v493_v20, %v282_v18 }
 0x110   : > { %v2694_v32 = vadd.f32 %v499_v29, %v286_v25  ;;  %v2696_v33 = vadd.f32 %v552_v31, %v294_v22  ;;  %v547_v29 = vadd.f32 %v546_v21, %v290_v19  ;;  %v496_v31 = vadd.f32 %v495_v23, %v286_v25 }
 0x114   : > { %v503_v34 = vpop.f32.mrb[4].mxu0  ;;  %v556_v35 = vpop.f32.mrb[4].mxu1 }
 0x115   : > { %v2698_v38 = vadd.f32 %v503_v34, %v282_v18  ;;  %v505_v47 = vpop.f32.mrb[5].mxu0  ;;  %v2700_v48 = vadd.f32 %v556_v35, %v290_v19  ;;  %v558_v51 = vpop.f32.mrb[5].mxu1  ;;  %v549_v34 = vadd.f32 %v548_v24, %v294_v22 }
 0x116   : > { %v2702_v9 = vadd.f32 %v505_v47, %v286_v25  ;;  %v507_v10 = vpop.f32.mrb[6].mxu0  ;;  %v2704_v11 = vadd.f32 %v558_v51, %v294_v22  ;;  %v560_v12 = vpop.f32.mrb[6].mxu1 }
 0x117   : > { %2820 = vst [vmem:[#allocation5_spill] sm:$0xff] %v2698_v38  ;;  %2821 = vst [vmem:[#allocation6_spill] sm:$0xff] %v2700_v48  ;;  %v2706_v13 = vadd.f32 %v507_v10, %v282_v18  ;;  %v509_v14 = vpop.f32.mrb[7].mxu0  ;;  %v2708_v15 = vadd.f32 %v560_v12, %v290_v19  ;;  %v562_v16 = vpop.f32.mrb[7].mxu1 }
 0x118   : > { %2822 = vst [vmem:[#allocation7_spill] sm:$0xff] %v2702_v9  ;;  %2823 = vst [vmem:[#allocation8_spill] sm:$0xff] %v2704_v11  ;;  %v2710_v17 = vadd.f32 %v509_v14, %v286_v25  ;;  %v2712_v26 = vadd.f32 %v562_v16, %v294_v22  ;;  %v582_v25 = vld [vmem:[#allocation4] sm:$0xff] }
 0x119   : > { %2824 = vst [vmem:[#allocation9_spill] sm:$0xff] %v2706_v13  ;;  %2825 = vst [vmem:[#allocation10_spill] sm:$0xff] %v2708_v15 }
 0x11a   : > { %2826 = vst [vmem:[#allocation11_spill] sm:$0xff] %v2710_v17 }
 0x12c   : > { %v814_v35 = vpop.f32.mrb[8].mxu0  ;;  %v855_v47 = vpop.f32.mrb[8].mxu1 }
 0x12d   : > { %v862_v3 = vadd.f32 %v814_v35, %v494_v27  ;;  %v864_v51 = vadd.f32 %v855_v47, %v547_v29  ;;  %v816_v11 = vpop.f32.mrb[9].mxu0  ;;  %v857_v9 = vpop.f32.mrb[9].mxu1  ;;  %v2827_v29 = vmov 0  }
 0x12e   : > { %v863_v10 = vadd.f32 %v816_v11, %v496_v31  ;;  %v865_v13 = vadd.f32 %v857_v9, %v549_v34  ;;  %v818_v48 = vpop.f32.mrb[10].mxu0  ;;  %v859_v12 = vpop.f32.mrb[10].mxu1 }
 0x12f   : > { %v1975_v15 = vmul.f32 -1.442695, %v862_v3  ;;  %v819_v38 = vpop.f32.mrb[11].mxu0  ;;  %v860_v14 = vpop.f32.mrb[11].mxu1 }
 0x130   : > { %v1976_v17 = vmul.f32 -1.442695, %v863_v10  ;;  %v1977_v18 = vmul.f32 -1.442695, %v865_v13 }
 0x131   : > { %2210 = vpow2.f32 %v1975_v15 }
 0x132   : > { %2212 = vpow2.f32 %v1976_v17 }
 0x133   : > { %2214 = vpow2.f32 %v1977_v18 }
 0x134   : > { %2216 = vtanh.f32 %v864_v51 }
 0x13b   : > { %v2211_v19 = vpop.eup %2210 }
 0x13c   : > { %v2213_v20 = vpop.eup %2212  ;;  %v869_v21 = vadd.f32 1.0, %v2211_v19 }
 0x13d   : > { %v875_v22 = vadd.f32 1.0, %v2213_v20  ;;  %v2215_v23 = vpop.eup %2214 }
 0x13e   : > { %2218 = vrcp.f32 %v869_v21  ;;  %v2217_v24 = vpop.eup %2216  ;;  %v882_v9 = vadd.f32 1.0, %v2215_v23 }
 0x13f   : > { %2220 = vrcp.f32 %v875_v22 }
 0x140   : > { %2222 = vrcp.f32 %v882_v9 }
 0x148   : > { %v2219_v48 = vpop.eup %2218 }
 0x149   : > { %v2221_v3 = vpop.eup %2220  ;;  %v886_v38 = vmul.f32 %v2219_v48, %v2217_v24 }
 0x14a   : > { %v885_v11 = vmul.f32 %v2221_v3, %v582_v25  ;;  %v2223_v13 = vpop.eup %2222 }
 0x14c   : > { %v2714_v15 = vadd.f32 %v886_v38, %v885_v11 }
 0x14e   : > { %2224 = vtanh.f32 %v2714_v15 }
 0x158   : > { %v2225_v16 = vpop.eup %2224 }
 0x159   : > { %v889_v17 = vmul.f32 %v2225_v16, %v2223_v13 }
 0x15b   : > { %890 = vst [vmem:[%s2351_s26] sm:$0xff] %v889_v17  ;;  %v896_v27 = vpack.c.bf16 %v889_v17, %v889_v17 }
 0x15d   : > { %1122 = vmatmul.mubr.bf16.vlgmr.msra.gmra.mrb[12].mxu0 %v896_v27  ;;  %1163 = vmatmul.mubr.bf16.vlgmr.msra.gmra.mrb[12].mxu1 %v896_v27 }
 0x15e   : > { %1400 = vmatpush1.bf16.msra.mxu0 %v2466_v39  ;;  %1441 = vmatpush1.bf16.msra.mxu1 %v2471_v40 }
 0x15f   : > { %1401 = vmatprep.subr.bf16.mxu0 %v2478_v41  ;;  %1442 = vmatprep.subr.bf16.mxu1 %v2483_v42 }
 0x160   : > { %1431 = vmatprep.mubr.bf16.mxu0 %v2827_v29  ;;  %1472 = vmatprep.mubr.bf16.mxu1 %v2827_v29 }
 0x162   : > { %1402 = vmatpush1.bf16.msra.mxu0 %v2490_v43  ;;  %1443 = vmatpush1.bf16.msra.mxu1 %v2495_v44 }
 0x163   : > { %1403 = vmatprep.subr.bf16.mxu0 %v2502_v45  ;;  %1444 = vmatprep.subr.bf16.mxu1 %v2507_v46 }
 0x166   : > { %1404 = vmatpush1.bf16.msra.mxu0 %v2516_v49  ;;  %1445 = vmatpush1.bf16.msra.mxu1 %v2521_v50 }
 0x167   : > { %1405 = vmatprep.subr.bf16.mxu0 %v2528_v52  ;;  %1446 = vmatprep.subr.bf16.mxu1 %v2535_v53 }
 0x16a   : > { %1406 = vmatpush1.bf16.msra.mxu0 %v2542_v54  ;;  %1447 = vmatpush1.bf16.msra.mxu1 %v2547_v55 }
 0x16b   : > { %1407 = vmatprep.subr.bf16.mxu0 %v2554_v56  ;;  %1448 = vmatprep.subr.bf16.mxu1 %v2559_v57 }
 0x16e   : > { %1408 = vmatpush1.bf16.msra.mxu0 %v2568_v58  ;;  %1449 = vmatpush1.bf16.msra.mxu1 %v2573_v59 }
 0x16f   : > { %1409 = vmatprep.subr.bf16.mxu0 %v2580_v60  ;;  %1450 = vmatprep.subr.bf16.mxu1 %v2585_v61 }
 0x172   : > { %1410 = vmatpush1.bf16.msra.mxu0 %v2592_v62  ;;  %1451 = vmatpush1.bf16.msra.mxu1 %v2597_v63 }
 0x173   : > { %1411 = vmatprep.subr.bf16.mxu0 %v2604_v0  ;;  %1452 = vmatprep.subr.bf16.mxu1 %v2609_v1 }
 0x176   : > { %1412 = vmatpush1.bf16.msra.mxu0 %v2616_v2  ;;  %1453 = vmatpush1.bf16.msra.mxu1 %v2621_v4 }
 0x177   : > { %1413 = vmatprep.subr.bf16.mxu0 %v2628_v5  ;;  %1454 = vmatprep.subr.bf16.mxu1 %v2633_v6 }
 0x17a   : > { %1414 = vmatpush1.bf16.msra.mxu0 %v2640_v7  ;;  %1455 = vmatpush1.bf16.msra.mxu1 %v2645_v8 }
 0x17b   : > { %1709 = vmatprep.subr.bf16.mxu0 %v2456_v36  ;;  %1750 = vmatprep.subr.bf16.mxu1 %v2461_v37 }
 0x230   : > { %v1123_v31 = vpop.f32.mrb[12].mxu0  ;;  %v1164_v34 = vpop.f32.mrb[12].mxu1 }
 0x231   : > { %v1171_v35 = vadd.f32 %v1123_v31, %v2690_v28  ;;  %v1173_v47 = vadd.f32 %v1164_v34, %v2692_v30  ;;  %v1125_v51 = vpop.f32.mrb[13].mxu0  ;;  %v1166_v10 = vpop.f32.mrb[13].mxu1 }
 0x232   : > { %v1172_v12 = vadd.f32 %v1125_v51, %v2694_v32  ;;  %v1174_v14 = vadd.f32 %v1166_v10, %v2696_v33  ;;  %v1127_v18 = vpop.f32.mrb[14].mxu0  ;;  %v1168_v19 = vpop.f32.mrb[14].mxu1  ;;  %v2832_v10 = vld [vmem:[#allocation9_spill] sm:$0xff] }
 0x233   : > { %v2010_v20 = vmul.f32 -1.442695, %v1171_v35  ;;  %v1128_v21 = vpop.f32.mrb[15].mxu0  ;;  %v1169_v22 = vpop.f32.mrb[15].mxu1 }
 0x234   : > { %v2011_v36 = vmul.f32 -1.442695, %v1172_v12  ;;  %v2012_v37 = vmul.f32 -1.442695, %v1174_v14  ;;  %v2833_v14 = vld [vmem:[#allocation10_spill] sm:$0xff]  ;;  %v2834_v21 = vld [vmem:[#allocation11_spill] sm:$0xff] }
 0x235   : > { %2226 = vpow2.f32 %v2010_v20 }
 0x236   : > { %2228 = vpow2.f32 %v2011_v36 }
 0x237   : > { %2230 = vpow2.f32 %v2012_v37 }
 0x238   : > { %2232 = vtanh.f32 %v1173_v47 }
 0x23f   : > { %v2227_v23 = vpop.eup %2226 }
 0x240   : > { %v2229_v24 = vpop.eup %2228  ;;  %v1178_v28 = vadd.f32 1.0, %v2227_v23 }
 0x241   : > { %v1184_v30 = vadd.f32 1.0, %v2229_v24  ;;  %v2231_v32 = vpop.eup %2230 }
 0x242   : > { %2234 = vrcp.f32 %v1178_v28  ;;  %v2233_v33 = vpop.eup %2232  ;;  %v1191_v38 = vadd.f32 1.0, %v2231_v32 }
 0x243   : > { %2236 = vrcp.f32 %v1184_v30 }
 0x244   : > { %2238 = vrcp.f32 %v1191_v38 }
 0x24c   : > { %v2235_v25 = vpop.eup %2234 }
 0x24d   : > { %v2237_v48 = vpop.eup %2236  ;;  %v1195_v3 = vmul.f32 %v2235_v25, %v2233_v33 }
 0x24e   : > { %v1194_v9 = vmul.f32 %v2237_v48, %v2714_v15  ;;  %v2239_v13 = vpop.eup %2238 }
 0x250   : > { %v2757_v11 = vadd.f32 %v1195_v3, %v1194_v9 }
 0x252   : > { %2240 = vtanh.f32 %v2757_v11 }
 0x25c   : > { %v2241_v16 = vpop.eup %2240 }
 0x25d   : > { %v1198_v17 = vmul.f32 %v2241_v16, %v2239_v13 }
 0x25f   : > { %2013 = vst [vmem:[%s2351_s26 + $0x8] sm:$0xff] %v1198_v17  ;;  %v1206_v27 = vpack.c.bf16 %v1198_v17, %v1198_v17 }
 0x261   : > { %1432 = vmatmul.mubr.bf16.vlgmr.msra.gmra.mrb[16].mxu0 %v1206_v27  ;;  %1473 = vmatmul.mubr.bf16.vlgmr.msra.gmra.mrb[16].mxu1 %v1206_v27 }
 0x262   : > { %1710 = vmatpush1.bf16.msra.mxu0 %v2466_v39  ;;  %1751 = vmatpush1.bf16.msra.mxu1 %v2471_v40 }
 0x263   : > { %1711 = vmatprep.subr.bf16.mxu0 %v2478_v41  ;;  %1752 = vmatprep.subr.bf16.mxu1 %v2483_v42  ;;  %v2828_v41 = vld [vmem:[#allocation5_spill] sm:$0xff] }
 0x264   : > { %1741 = vmatprep.mubr.bf16.mxu0 %v2827_v29  ;;  %1782 = vmatprep.mubr.bf16.mxu1 %v2827_v29 }
 0x266   : > { %1712 = vmatpush1.bf16.msra.mxu0 %v2490_v43  ;;  %1753 = vmatpush1.bf16.msra.mxu1 %v2495_v44  ;;  %v2829_v43 = vld [vmem:[#allocation6_spill] sm:$0xff] }
 0x267   : > { %1713 = vmatprep.subr.bf16.mxu0 %v2502_v45  ;;  %1754 = vmatprep.subr.bf16.mxu1 %v2507_v46 }
 0x26a   : > { %1714 = vmatpush1.bf16.msra.mxu0 %v2516_v49  ;;  %1755 = vmatpush1.bf16.msra.mxu1 %v2521_v50  ;;  %v2830_v49 = vld [vmem:[#allocation7_spill] sm:$0xff] }
 0x26b   : > { %1715 = vmatprep.subr.bf16.mxu0 %v2528_v52  ;;  %1756 = vmatprep.subr.bf16.mxu1 %v2535_v53  ;;  %v2831_v52 = vld [vmem:[#allocation8_spill] sm:$0xff] }
 0x26e   : > { %1716 = vmatpush1.bf16.msra.mxu0 %v2542_v54  ;;  %1757 = vmatpush1.bf16.msra.mxu1 %v2547_v55 }
 0x26f   : > { %1717 = vmatprep.subr.bf16.mxu0 %v2554_v56  ;;  %1758 = vmatprep.subr.bf16.mxu1 %v2559_v57 }
 0x272   : > { %1718 = vmatpush1.bf16.msra.mxu0 %v2568_v58  ;;  %1759 = vmatpush1.bf16.msra.mxu1 %v2573_v59 }
 0x273   : > { %1719 = vmatprep.subr.bf16.mxu0 %v2580_v60  ;;  %1760 = vmatprep.subr.bf16.mxu1 %v2585_v61 }
 0x276   : > { %1720 = vmatpush1.bf16.msra.mxu0 %v2592_v62  ;;  %1761 = vmatpush1.bf16.msra.mxu1 %v2597_v63 }
 0x277   : > { %1721 = vmatprep.subr.bf16.mxu0 %v2604_v0  ;;  %1762 = vmatprep.subr.bf16.mxu1 %v2609_v1 }
 0x27a   : > { %1722 = vmatpush1.bf16.msra.mxu0 %v2616_v2  ;;  %1763 = vmatpush1.bf16.msra.mxu1 %v2621_v4 }
 0x27b   : > { %1723 = vmatprep.subr.bf16.mxu0 %v2628_v5  ;;  %1764 = vmatprep.subr.bf16.mxu1 %v2633_v6 }
 0x27e   : > { %1724 = vmatpush1.bf16.msra.mxu0 %v2640_v7  ;;  %1765 = vmatpush1.bf16.msra.mxu1 %v2645_v8 }
 0x334   : > { %v1433_v39 = vpop.f32.mrb[16].mxu0  ;;  %v1474_v40 = vpop.f32.mrb[16].mxu1 }
 0x335   : > { %v1481_v42 = vadd.f32 %v1433_v39, %v2828_v41  ;;  %v1483_v44 = vadd.f32 %v1474_v40, %v2829_v43  ;;  %v1435_v45 = vpop.f32.mrb[17].mxu0  ;;  %v1476_v46 = vpop.f32.mrb[17].mxu1 }
 0x336   : > { %v1482_v50 = vadd.f32 %v1435_v45, %v2830_v49  ;;  %v1484_v53 = vadd.f32 %v1476_v46, %v2831_v52  ;;  %v1437_v54 = vpop.f32.mrb[18].mxu0  ;;  %v1478_v55 = vpop.f32.mrb[18].mxu1 }
 0x337   : > { %v2046_v56 = vmul.f32 -1.442695, %v1481_v42  ;;  %v1438_v57 = vpop.f32.mrb[19].mxu0  ;;  %v1479_v58 = vpop.f32.mrb[19].mxu1 }
 0x338   : > { %v2047_v59 = vmul.f32 -1.442695, %v1482_v50  ;;  %v2048_v60 = vmul.f32 -1.442695, %v1484_v53 }
 0x339   : > { %2242 = vpow2.f32 %v2046_v56 }
 0x33a   : > { %2244 = vpow2.f32 %v2047_v59 }
 0x33b   : > { %2246 = vpow2.f32 %v2048_v60 }
 0x33c   : > { %2248 = vtanh.f32 %v1483_v44 }
 0x343   : > { %v2243_v61 = vpop.eup %2242 }
 0x344   : > { %v2245_v62 = vpop.eup %2244  ;;  %v1488_v63 = vadd.f32 1.0, %v2243_v61 }
 0x345   : > { %v1494_v0 = vadd.f32 1.0, %v2245_v62  ;;  %v2247_v1 = vpop.eup %2246 }
 0x346   : > { %2250 = vrcp.f32 %v1488_v63  ;;  %v2249_v2 = vpop.eup %2248  ;;  %v1501_v7 = vadd.f32 1.0, %v2247_v1 }
 0x347   : > { %2252 = vrcp.f32 %v1494_v0 }
 0x348   : > { %2254 = vrcp.f32 %v1501_v7 }
 0x350   : > { %v2251_v4 = vpop.eup %2250 }
 0x351   : > { %v2253_v5 = vpop.eup %2252  ;;  %v1505_v6 = vmul.f32 %v2251_v4, %v2249_v2 }
 0x352   : > { %v1504_v8 = vmul.f32 %v2253_v5, %v2757_v11  ;;  %v2255_v29 = vpop.eup %2254 }
 0x354   : > { %v1506_v15 = vadd.f32 %v1505_v6, %v1504_v8 }
 0x356   : > { %2256 = vtanh.f32 %v1506_v15 }
 0x360   : > { %v2257_v31 = vpop.eup %2256 }
 0x361   : > { %v1508_v34 = vmul.f32 %v2257_v31, %v2255_v29 }
 0x363   : > { %2049 = vst [vmem:[%s2351_s26 + $0x10] sm:$0xff] %v1508_v34  ;;  %v1516_v35 = vpack.c.bf16 %v1508_v34, %v1508_v34 }
 0x365   : > { %1742 = vmatmul.mubr.bf16.vlgmr.msra.gmra.mrb[20].mxu0 %v1516_v35  ;;  %1783 = vmatmul.mubr.bf16.vlgmr.msra.gmra.mrb[20].mxu1 %v1516_v35 }
 0x438   : > { %v1743_v47 = vpop.f32.mrb[20].mxu0  ;;  %v1784_v51 = vpop.f32.mrb[20].mxu1 }
 0x439   : > { %v1791_v12 = vadd.f32 %v1743_v47, %v2832_v10  ;;  %v1793_v18 = vadd.f32 %v1784_v51, %v2833_v14  ;;  %v1745_v19 = vpop.f32.mrb[21].mxu0  ;;  %v1786_v20 = vpop.f32.mrb[21].mxu1 }
 0x43a   : > { %v1792_v22 = vadd.f32 %v1745_v19, %v2834_v21  ;;  %v1794_v36 = vadd.f32 %v1786_v20, %v2712_v26  ;;  %v1747_v37 = vpop.f32.mrb[22].mxu0  ;;  %v1788_v23 = vpop.f32.mrb[22].mxu1 }
 0x43b   : > { %v2082_v24 = vmul.f32 -1.442695, %v1791_v12  ;;  %v1748_v28 = vpop.f32.mrb[23].mxu0  ;;  %v1789_v30 = vpop.f32.mrb[23].mxu1 }
 0x43c   : > { %v2083_v32 = vmul.f32 -1.442695, %v1792_v22  ;;  %v2084_v33 = vmul.f32 -1.442695, %v1794_v36 }
 0x43d   : > { %2258 = vpow2.f32 %v2082_v24 }
 0x43e   : > { %2260 = vpow2.f32 %v2083_v32 }
 0x43f   : > { %2262 = vpow2.f32 %v2084_v33 }
 0x440   : > { %2264 = vtanh.f32 %v1793_v18 }
 0x447   : > { %v2259_v25 = vpop.eup %2258 }
 0x448   : > { %v2261_v48 = vpop.eup %2260  ;;  %v1798_v3 = vadd.f32 1.0, %v2259_v25 }
 0x449   : > { %v1804_v38 = vadd.f32 1.0, %v2261_v48  ;;  %v2263_v9 = vpop.eup %2262 }
 0x44a   : > { %2266 = vrcp.f32 %v1798_v3  ;;  %v2265_v26 = vpop.eup %2264  ;;  %v1811_v17 = vadd.f32 1.0, %v2263_v9 }
 0x44b   : > { %2268 = vrcp.f32 %v1804_v38 }
 0x44c   : > { %2270 = vrcp.f32 %v1811_v17 }
 0x454   : > { %v2267_v11 = vpop.eup %2266 }
 0x455   : > { %v2269_v13 = vpop.eup %2268  ;;  %v1815_v16 = vmul.f32 %v2267_v11, %v2265_v26 }
 0x456   : > { %v1814_v27 = vmul.f32 %v2269_v13, %v1506_v15  ;;  %v2271_v40 = vpop.eup %2270 }
 0x458   : > { %v1816_v39 = vadd.f32 %v1815_v16, %v1814_v27 }
 0x45a   : > { %2272 = vtanh.f32 %v1816_v39  ;;  %1822 = vst [vmem:[#allocation4] sm:$0xff] %v1816_v39 }
 0x464   : > { %v2273_v41 = vpop.eup %2272 }
 0x465   : > { %v1818_v42 = vmul.f32 %v2273_v41, %v2271_v40 }
 0x467   : > { %2085 = vst [vmem:[%s2351_s26 + $0x18] sm:$0xff] %v1818_v42  ;;  %1821 = vst [vmem:[#allocation3] sm:$0xff] %v1818_v42 }
 0x468 PF: > { %s14_s17 = sadd.s32 1, %s2296_s17   ;;  %s2835_s15 = smov %s2292_s16 }
 0x469   : > { %p11_p6 = scmp.ge.s32.totalorder %s14_s17, 5   ;;  %s2836_s16 = smov %s2838_s18 }
 0x46b   :  { %13 = sbr.rel (!%p11_p6) target bundleno = 2 (0x2), region = 76 }

</bundles_post_ra>
